<compile_context>
chip_gen: v7x
topology: tpu7x:2x2x1
jax: 0.10.0
libtpu: 0.0.40
codegen_flags: <defaults>
</compile_context>

<pallas_src>
import functools

import jax
import jax.numpy as jnp
from jax import lax
from jax.experimental import pallas as pl
from jax.experimental.pallas import tpu as pltpu


def _round_up(a, b):
    return ((a + b - 1) // b) * b


def xw_kernel(x_ref, w_ref, out_ref):
    """out_tile = x_tile @ W   (single MXU matmul per row tile)."""
    out_ref[...] = jnp.dot(
        x_ref[...], w_ref[...], preferred_element_type=jnp.float32
    ).astype(out_ref.dtype)


def agg_kernel(edge_r_ref, edge_c_ref, xw_ref, out_ref, acc_ref):
    """acc += adj_tile @ xw_tile;  out = relu(acc) on the last column tile.

    adj_tile (TM, TN) is built on the MXU from one-hot edge indicators:
      adj_tile = min(S_rows @ D_cols + D_rows @ S_cols, 1)
    which matches the reference's symmetric `.set(1.0)` semantics (duplicate
    edges and self-loops collapse to 1).  The clamp is per (row, col) entry and
    each entry belongs to exactly one column tile, so tiling the columns keeps
    dedupe exact.
    """
    TM = out_ref.shape[0]
    TN = xw_ref.shape[0]
    Ep = edge_r_ref.shape[1]
    i = pl.program_id(0)
    k = pl.program_id(1)
    row_start = i * TM
    col_start = k * TN

    @pl.when(k == 0)
    def _():
        acc_ref[...] = jnp.zeros_like(acc_ref)

    src_row = edge_r_ref[0:1, :]          # [1, Ep]  edge sources (lane axis = edges)
    dst_row = edge_r_ref[1:2, :]          # [1, Ep]
    src_col = edge_c_ref[:, 0:1]          # [Ep, 1]  edge sources (sublane axis = edges)
    dst_col = edge_c_ref[:, 1:2]          # [Ep, 1]

    # One-hot indicators for this tile's rows: [TM, Ep].
    row_ids = lax.broadcasted_iota(jnp.int32, (TM, Ep), 0) + row_start
    s_rows = (row_ids == src_row).astype(jnp.float32)
    d_rows = (row_ids == dst_row).astype(jnp.float32)

    # One-hot indicators for this tile's columns: [Ep, TN].
    col_ids = lax.broadcasted_iota(jnp.int32, (Ep, TN), 1) + col_start
    s_cols = (src_col == col_ids).astype(jnp.float32)
    d_cols = (dst_col == col_ids).astype(jnp.float32)

    # Adjacency tile on the MXU; clamp reproduces `.set(1)` dedupe semantics.
    adj_tile = jnp.minimum(
        jnp.dot(s_rows, d_cols, preferred_element_type=jnp.float32)
        + jnp.dot(d_rows, s_cols, preferred_element_type=jnp.float32),
        1.0,
    )

    acc_ref[...] += jnp.dot(
        adj_tile, xw_ref[...], preferred_element_type=jnp.float32
    )

    @pl.when(k == pl.num_programs(1) - 1)
    def _():
        out_ref[...] = jnp.maximum(acc_ref[...], 0.0).astype(out_ref.dtype)


def _compiler_params(working_set_bytes, dimension_semantics):
    # Explicit VMEM budget (default scoped limit is 16/32 MiB); double-buffer
    # margin, clamped so it stays portable across v5e/v6e/v7x (64 MiB/TC).
    limit = int(min(max(2 * working_set_bytes + (4 << 20), 16 << 20), 48 << 20))
    return pltpu.CompilerParams(
        dimension_semantics=dimension_semantics,
        vmem_limit_bytes=limit,
    )


@functools.partial(jax.jit, static_argnums=(3,))
def graph_conv_sparse(x, weight, edge_index, num_nodes):
    """relu(adj(edge_index) @ x @ weight), adjacency built tile-wise in-kernel."""
    N = num_nodes
    D_in = x.shape[1]
    D_out = weight.shape[1]
    E = edge_index.shape[1]
    assert x.shape[0] == N

    TM = 128                                   # output-row tile
    TN = 128                                   # node-column (reduction) tile
    Np = _round_up(max(N, 1), max(TM, TN))
    Dk = _round_up(D_in, 128)
    Do = _round_up(D_out, 128)                 # lane-dense output width
    Ep = _round_up(max(E, 1), 128)

    f32 = jnp.float32
    x_p = jnp.zeros((Np, Dk), f32).at[:N, :D_in].set(x.astype(f32))
    w_p = jnp.zeros((Dk, Do), f32).at[:D_in, :D_out].set(weight.astype(f32))

    e = edge_index.astype(jnp.int32)
    e_rows = jnp.full((2, Ep), -1, jnp.int32).at[:, :E].set(e)   # [2, Ep]
    e_cols = e_rows.T                                            # [Ep, 2]

    n_row_tiles = Np // TM
    n_col_tiles = Np // TN

    # ---- Stage 1: xw = x @ W (computed once, row-tiled) ----
    xw_bytes = 4 * (TM * Dk + Dk * Do + TM * Do)
    xw = pl.pallas_call(
        xw_kernel,
        out_shape=jax.ShapeDtypeStruct((Np, Do), f32),
        grid_spec=pltpu.PrefetchScalarGridSpec(
            num_scalar_prefetch=0,
            grid=(n_row_tiles,),
            in_specs=[
                pl.BlockSpec((TM, Dk), lambda i: (i, 0)),
                pl.BlockSpec((Dk, Do), lambda i: (0, 0)),
            ],
            out_specs=pl.BlockSpec((TM, Do), lambda i: (i, 0)),
        ),
        compiler_params=_compiler_params(xw_bytes, ("parallel",)),
    )(x_p, w_p)

    # ---- Stage 2: out = relu(adj @ xw), adjacency built tile-wise on the MXU ----
    agg_bytes = 4 * (
        2 * (TN * Do)      # double-buffered xw column tile
        + 2 * (TM * Do)    # double-buffered out tile
        + TM * Do          # accumulator scratch
        + TM * TN          # adjacency tile
        + 2 * Ep * TN      # column one-hots
        + 2 * Ep * TM      # row one-hots
        + 2 * 128 * Ep     # edge index tiles (sublane padded)
    )
    out_p = pl.pallas_call(
        agg_kernel,
        out_shape=jax.ShapeDtypeStruct((Np, Do), f32),
        grid_spec=pltpu.PrefetchScalarGridSpec(
            num_scalar_prefetch=0,
            grid=(n_row_tiles, n_col_tiles),
            in_specs=[
                pl.BlockSpec((2, Ep), lambda i, k: (0, 0)),
                pl.BlockSpec((Ep, 2), lambda i, k: (0, 0)),
                pl.BlockSpec((TN, Do), lambda i, k: (k, 0)),
            ],
            out_specs=pl.BlockSpec((TM, Do), lambda i, k: (i, 0)),
            scratch_shapes=[pltpu.VMEM((TM, Do), jnp.float32)],
        ),
        compiler_params=_compiler_params(agg_bytes, ("parallel", "arbitrary")),
    )(e_rows, e_cols, xw)

    return out_p[:N, :D_out]


def reference(x, weight, edge_index, num_nodes):
    adj = jnp.zeros((num_nodes, num_nodes), jnp.float32)
    adj = adj.at[edge_index[0], edge_index[1]].set(1.0)
    adj = adj.at[edge_index[1], edge_index[0]].set(1.0)
    return jnp.maximum(adj @ (x @ weight), 0.0)


if __name__ == "__main__":
    num_nodes = 16
    input_dim = 32
    output_dim = 64
    num_edges = 24

    key = jax.random.PRNGKey(0)
    k_x, k_w, k_e0, k_e1 = jax.random.split(key, 4)

    # Node features.
    x = jax.random.normal(k_x, (num_nodes, input_dim), dtype=jnp.float32)

    # Xavier-uniform weight init (same scheme as nn.init.xavier_uniform_).
    init_range = (6.0 / (input_dim + output_dim)) ** 0.5
    weight = jax.random.uniform(
        k_w, (input_dim, output_dim), dtype=jnp.float32,
        minval=-init_range, maxval=init_range)

    # Deterministic random edge list, shape [2, num_edges].
    e0 = jax.random.randint(k_e0, (num_edges,), 0, num_nodes, dtype=jnp.int32)
    e1 = jax.random.randint(k_e1, (num_edges,), 0, num_nodes, dtype=jnp.int32)
    edge_index = jnp.stack([e0, e1], axis=0)

    out = graph_conv_sparse(x, weight, edge_index, num_nodes)
    out = jax.block_until_ready(out)

    ref = reference(x, weight, edge_index, num_nodes)
    assert out.shape == (num_nodes, output_dim)
    assert jnp.allclose(out, ref, atol=1e-5, rtol=1e-5), "mismatch vs reference"

    print("KERNEL_OK")
</pallas_src>

<mosaic_0001>
module attributes {stable_mosaic.version = 11 : i64} {
  func.func @xw_kernel(%arg0: i32, %arg1: memref<128x128xf32, #tpu.memory_space<vmem>>, %arg2: memref<128x128xf32, #tpu.memory_space<vmem>>, %arg3: memref<128x128xf32, #tpu.memory_space<vmem>>) attributes {dimension_semantics = [#tpu.dimension_semantics<parallel>], iteration_bounds = array<i64: 1>, scalar_prefetch = 0 : i64, scratch_operands = 0 : i64, tpu.core_type = #tpu.core_type<tc>, window_params = [{transform_indices = @transform_0, window_bounds = array<i64: 128, 128>}, {pipeline_mode = #tpu.pipeline_mode<synchronous>, transform_indices = @transform_1, window_bounds = array<i64: 128, 128>}, {transform_indices = @transform_2, window_bounds = array<i64: 128, 128>}]} {
    %c0 = arith.constant 0 : index
    %c0_0 = arith.constant 0 : index
    %0 = vector.load %arg1[%c0, %c0_0] : memref<128x128xf32, #tpu.memory_space<vmem>>, vector<128x128xf32>
    %c0_1 = arith.constant 0 : index
    %c0_2 = arith.constant 0 : index
    %1 = vector.load %arg2[%c0_1, %c0_2] : memref<128x128xf32, #tpu.memory_space<vmem>>, vector<128x128xf32>
    %cst = arith.constant dense<0.000000e+00> : vector<128x128xf32>
    %2 = tpu.matmul %0, %1, %cst {dimension_numbers = #tpu.dot_dimension_numbers<[1], [0], [0], [1], [0, 0, 1, 1], [], []>} : vector<128x128xf32>, vector<128x128xf32>, vector<128x128xf32> -> vector<128x128xf32>
    %c0_3 = arith.constant 0 : index
    %c0_4 = arith.constant 0 : index
    %3 = vector.load %arg3[%c0_3, %c0_4] : memref<128x128xf32, #tpu.memory_space<vmem>>, vector<128x128xf32>
    tpu.vector_store %arg3[%c0_3, %c0_4], %2 {strides = array<i32>} : memref<128x128xf32, #tpu.memory_space<vmem>>, vector<128x128xf32>,
    return
  }
  func.func @transform_0(%arg0: i32) -> (i32, i32) {
    %c0_i32 = arith.constant 0 : i32
    %c0_i32_0 = arith.constant 0 : i32
    return %arg0, %c0_i32 : i32, i32
  }
  func.func @transform_1(%arg0: i32) -> (i32, i32) {
    %c0_i32 = arith.constant 0 : i32
    %c0_i32_0 = arith.constant 0 : i32
    %c0_i32_1 = arith.constant 0 : i32
    return %c0_i32, %c0_i32_0 : i32, i32
  }
  func.func @transform_2(%arg0: i32) -> (i32, i32) {
    %c0_i32 = arith.constant 0 : i32
    %c0_i32_0 = arith.constant 0 : i32
    return %arg0, %c0_i32 : i32, i32
  }
}

module attributes {stable_mosaic.version = 11 : i64} {
  func.func @agg_kernel(%arg0: i32, %arg1: i32, %arg2: memref<2x128xi32, #tpu.memory_space<vmem>>, %arg3: memref<128x2xi32, #tpu.memory_space<vmem>>, %arg4: memref<128x128xf32, #tpu.memory_space<vmem>>, %arg5: memref<128x128xf32, #tpu.memory_space<vmem>>, %arg6: memref<128x128xf32, #tpu.memory_space<vmem>>) attributes {dimension_semantics = [#tpu.dimension_semantics<parallel>, #tpu.dimension_semantics<arbitrary>], iteration_bounds = array<i64: 1, 1>, scalar_prefetch = 0 : i64, scratch_operands = 1 : i64, tpu.core_type = #tpu.core_type<tc>, window_params = [{pipeline_mode = #tpu.pipeline_mode<synchronous>, transform_indices = @transform_0, window_bounds = array<i64: 2, 128>}, {pipeline_mode = #tpu.pipeline_mode<synchronous>, transform_indices = @transform_1, window_bounds = array<i64: 128, 2>}, {transform_indices = @transform_2, window_bounds = array<i64: 128, 128>}, {transform_indices = @transform_3, window_bounds = array<i64: 128, 128>}]} {
    %c128_i32 = arith.constant 128 : i32
    %0 = arith.muli %arg0, %c128_i32 : i32
    %c128_i32_0 = arith.constant 128 : i32
    %1 = arith.muli %arg1, %c128_i32_0 : i32
    %c0_i32 = arith.constant 0 : i32
    %2 = arith.cmpi eq, %arg1, %c0_i32 : i32
    %3 = arith.extui %2 : i1 to i32
    %c0_i32_1 = arith.constant 0 : i32
    %4 = arith.cmpi ne, %3, %c0_i32_1 : i32
    scf.if %4 {
      %cst_19 = arith.constant 0.000000e+00 : f32
      %44 = vector.broadcast %cst_19 : f32 to vector<128x128xf32>
      %c0_20 = arith.constant 0 : index
      %c0_21 = arith.constant 0 : index
      %45 = vector.load %arg6[%c0_20, %c0_21] : memref<128x128xf32, #tpu.memory_space<vmem>>, vector<128x128xf32>
      tpu.vector_store %arg6[%c0_20, %c0_21], %44 {strides = array<i32>} : memref<128x128xf32, #tpu.memory_space<vmem>>, vector<128x128xf32>,
    } else {
    }
    %c0 = arith.constant 0 : index
    %c0_2 = arith.constant 0 : index
    %5 = vector.load %arg2[%c0, %c0_2] : memref<2x128xi32, #tpu.memory_space<vmem>>, vector<1x128xi32>
    %c1 = arith.constant 1 : index
    %c0_3 = arith.constant 0 : index
    %6 = vector.load %arg2[%c1, %c0_3] : memref<2x128xi32, #tpu.memory_space<vmem>>, vector<1x128xi32>
    %c0_4 = arith.constant 0 : index
    %c0_5 = arith.constant 0 : index
    %7 = vector.load %arg3[%c0_4, %c0_5] : memref<128x2xi32, #tpu.memory_space<vmem>>, vector<128x1xi32>
    %c0_6 = arith.constant 0 : index
    %c1_7 = arith.constant 1 : index
    %8 = vector.load %arg3[%c0_6, %c1_7] : memref<128x2xi32, #tpu.memory_space<vmem>>, vector<128x1xi32>
    %9 = tpu.iota {dimensions = array<i32: 0>} : vector<128x128xi32>
    %10 = vector.broadcast %0 : i32 to vector<128x128xi32>
    %11 = arith.addi %9, %10 : vector<128x128xi32>
    %12 = vector.broadcast %5 : vector<1x128xi32> to vector<128x128xi32>
    %13 = arith.cmpi eq, %11, %12 : vector<128x128xi32>
    %14 = arith.extui %13 : vector<128x128xi1> to vector<128x128xi32>
    %15 = arith.sitofp %14 : vector<128x128xi32> to vector<128x128xf32>
    %16 = vector.broadcast %6 : vector<1x128xi32> to vector<128x128xi32>
    %17 = arith.cmpi eq, %11, %16 : vector<128x128xi32>
    %18 = arith.extui %17 : vector<128x128xi1> to vector<128x128xi32>
    %19 = arith.sitofp %18 : vector<128x128xi32> to vector<128x128xf32>
    %20 = tpu.iota {dimensions = array<i32: 1>} : vector<128x128xi32>
    %21 = vector.broadcast %1 : i32 to vector<128x128xi32>
    %22 = arith.addi %20, %21 : vector<128x128xi32>
    %23 = vector.broadcast %7 : vector<128x1xi32> to vector<128x128xi32>
    %24 = arith.cmpi eq, %23, %22 : vector<128x128xi32>
    %25 = arith.extui %24 : vector<128x128xi1> to vector<128x128xi32>
    %26 = arith.sitofp %25 : vector<128x128xi32> to vector<128x128xf32>
    %27 = vector.broadcast %8 : vector<128x1xi32> to vector<128x128xi32>
    %28 = arith.cmpi eq, %27, %22 : vector<128x128xi32>
    %29 = arith.extui %28 : vector<128x128xi1> to vector<128x128xi32>
    %30 = arith.sitofp %29 : vector<128x128xi32> to vector<128x128xf32>
    %cst = arith.constant dense<0.000000e+00> : vector<128x128xf32>
    %31 = tpu.matmul %15, %30, %cst {dimension_numbers = #tpu.dot_dimension_numbers<[1], [0], [0], [1], [0, 0, 1, 1], [], []>} : vector<128x128xf32>, vector<128x128xf32>, vector<128x128xf32> -> vector<128x128xf32>
    %cst_8 = arith.constant dense<0.000000e+00> : vector<128x128xf32>
    %32 = tpu.matmul %19, %26, %cst_8 {dimension_numbers = #tpu.dot_dimension_numbers<[1], [0], [0], [1], [0, 0, 1, 1], [], []>} : vector<128x128xf32>, vector<128x128xf32>, vector<128x128xf32> -> vector<128x128xf32>
    %33 = arith.addf %31, %32 : vector<128x128xf32>
    %cst_9 = arith.constant 1.000000e+00 : f32
    %34 = vector.broadcast %cst_9 : f32 to vector<128x128xf32>
    %35 = arith.minimumf %33, %34 : vector<128x128xf32>
    %c0_10 = arith.constant 0 : index
    %c0_11 = arith.constant 0 : index
    %36 = vector.load %arg6[%c0_10, %c0_11] : memref<128x128xf32, #tpu.memory_space<vmem>>, vector<128x128xf32>
    %c0_12 = arith.constant 0 : index
    %c0_13 = arith.constant 0 : index
    %37 = vector.load %arg4[%c0_12, %c0_13] : memref<128x128xf32, #tpu.memory_space<vmem>>, vector<128x128xf32>
    %cst_14 = arith.constant dense<0.000000e+00> : vector<128x128xf32>
    %38 = tpu.matmul %35, %37, %cst_14 {dimension_numbers = #tpu.dot_dimension_numbers<[1], [0], [0], [1], [0, 0, 1, 1], [], []>} : vector<128x128xf32>, vector<128x128xf32>, vector<128x128xf32> -> vector<128x128xf32>
    %39 = arith.addf %36, %38 : vector<128x128xf32>
    %c0_15 = arith.constant 0 : index
    %c0_16 = arith.constant 0 : index
    %40 = vector.load %arg6[%c0_15, %c0_16] : memref<128x128xf32, #tpu.memory_space<vmem>>, vector<128x128xf32>
    tpu.vector_store %arg6[%c0_15, %c0_16], %39 {strides = array<i32>} : memref<128x128xf32, #tpu.memory_space<vmem>>, vector<128x128xf32>,
    %c0_i32_17 = arith.constant 0 : i32
    %41 = arith.cmpi eq, %arg1, %c0_i32_17 : i32
    %42 = arith.extui %41 : i1 to i32
    %c0_i32_18 = arith.constant 0 : i32
    %43 = arith.cmpi ne, %42, %c0_i32_18 : i32
    scf.if %43 {
      %c0_19 = arith.constant 0 : index
      %c0_20 = arith.constant 0 : index
      %44 = vector.load %arg6[%c0_19, %c0_20] : memref<128x128xf32, #tpu.memory_space<vmem>>, vector<128x128xf32>
      %cst_21 = arith.constant 0.000000e+00 : f32
      %45 = vector.broadcast %cst_21 : f32 to vector<128x128xf32>
      %46 = arith.maximumf %44, %45 : vector<128x128xf32>
      %c0_22 = arith.constant 0 : index
      %c0_23 = arith.constant 0 : index
      %47 = vector.load %arg5[%c0_22, %c0_23] : memref<128x128xf32, #tpu.memory_space<vmem>>, vector<128x128xf32>
      tpu.vector_store %arg5[%c0_22, %c0_23], %46 {strides = array<i32>} : memref<128x128xf32, #tpu.memory_space<vmem>>, vector<128x128xf32>,
    } else {
    }
    return
  }
  func.func @transform_0(%arg0: i32, %arg1: i32) -> (i32, i32) {
    %c0_i32 = arith.constant 0 : i32
    %c0_i32_0 = arith.constant 0 : i32
    %c0_i32_1 = arith.constant 0 : i32
    return %c0_i32, %c0_i32_0 : i32, i32
  }
  func.func @transform_1(%arg0: i32, %arg1: i32) -> (i32, i32) {
    %c0_i32 = arith.constant 0 : i32
    %c0_i32_0 = arith.constant 0 : i32
    %c0_i32_1 = arith.constant 0 : i32
    return %c0_i32, %c0_i32_0 : i32, i32
  }
  func.func @transform_2(%arg0: i32, %arg1: i32) -> (i32, i32) {
    %c0_i32 = arith.constant 0 : i32
    %c0_i32_0 = arith.constant 0 : i32
    return %arg1, %c0_i32 : i32, i32
  }
  func.func @transform_3(%arg0: i32, %arg1: i32) -> (i32, i32) {
    %c0_i32 = arith.constant 0 : i32
    %c0_i32_0 = arith.constant 0 : i32
    return %arg0, %c0_i32 : i32, i32
  }
}

</mosaic_0001>

<bundles_post_ra>
// kernel: graph_conv_sparse.2
= control target key start
LH: loop header
LB: loop body
LE: loop exit
PB: predicated region body
PF: predicated region fallthrough
CT: control target
= control target key end

     0   :  { %s503_s1 = inlined_call_operand.vmem [shape: f32[128,128], index: 1, kind: input, shape index: {}]   ;;  %s504_s0 = inlined_call_operand.vmem [shape: f32[128,128], index: 0, kind: input, shape index: {}]   ;;  %s505_s2 = inlined_call_operand.vmem [shape: f32[128,128], index: 2, kind: output, shape index: {}]  }
   0x1   :  { %v27_v0 = vld [vmem:[%s503_s1] sm:$0xff]  ;;  %v28_v1 = vld [vmem:[%s503_s1 + $0x8] sm:$0xff]  ;;  %v29_v2 = vld [vmem:[%s503_s1 + $0x10] sm:$0xff] }
   0x2   :  { %v296_v3 = vpack.c.bf16 %v28_v1, %v27_v0  ;;  %v30_v4 = vld [vmem:[%s503_s1 + $0x18] sm:$0xff]  ;;  %v31_v6 = vld [vmem:[%s503_s1 + $0x20] sm:$0xff]  ;;  %v32_v7 = vld [vmem:[%s503_s1 + $0x28] sm:$0xff] }
   0x3   :  { %v300_v5 = vpack.c.bf16 %v30_v4, %v29_v2  ;;  %v304_v8 = vpack.c.bf16 %v32_v7, %v31_v6  ;;  %v11_v9 = vld [vmem:[%s504_s0] sm:$0xff]  ;;  %v33_v11 = vld [vmem:[%s503_s1 + $0x30] sm:$0xff]  ;;  %v34_v12 = vld [vmem:[%s503_s1 + $0x38] sm:$0xff] }
   0x4   :  { %297 = vmatprep.subr.bf16.mxu0 %v296_v3  ;;  %328 = vmatprep.subr.bf16.mxu1 %v296_v3  ;;  %v19_v10 = vld [vmem:[%s504_s0 + $0x40] sm:$0xff]  ;;  %v308_v13 = vpack.c.bf16 %v34_v12, %v33_v11  ;;  %v36_v15 = vld [vmem:[%s503_s1 + $0x48] sm:$0xff]  ;;  %v37_v17 = vld [vmem:[%s503_s1 + $0x50] sm:$0xff] }
   0x5   :  { %299 = vmatpush3.bf16.msra.mxu0 %v296_v3  ;;  %336 = vmatpush3.bf16.msra.mxu1 %v296_v3  ;;  %v35_v14 = vld [vmem:[%s503_s1 + $0x40] sm:$0xff]  ;;  %v38_v18 = vld [vmem:[%s503_s1 + $0x58] sm:$0xff]  ;;  %v40_v21 = vld [vmem:[%s503_s1 + $0x68] sm:$0xff] }
   0x6   :  { %301 = vmatprep.subr.bf16.mxu0 %v300_v5  ;;  %329 = vmatprep.subr.bf16.mxu1 %v300_v5  ;;  %v312_v16 = vpack.c.bf16 %v36_v15, %v35_v14  ;;  %v316_v19 = vpack.c.bf16 %v38_v18, %v37_v17  ;;  %v39_v20 = vld [vmem:[%s503_s1 + $0x60] sm:$0xff]  ;;  %v41_v23 = vld [vmem:[%s503_s1 + $0x70] sm:$0xff]  ;;  %v42_v24 = vld [vmem:[%s503_s1 + $0x78] sm:$0xff] }
   0x7   :  { %272 = vmatprep.mubr.f32.mxu0 %v11_v9  ;;  %284 = vmatprep.mubr.f32.mxu1 %v19_v10  ;;  %v320_v22 = vpack.c.bf16 %v40_v21, %v39_v20  ;;  %v324_v25 = vpack.c.bf16 %v42_v24, %v41_v23  ;;  %v12_v26 = vld [vmem:[%s504_s0 + $0x8] sm:$0xff]  ;;  %v13_v28 = vld [vmem:[%s504_s0 + $0x10] sm:$0xff]  ;;  %v14_v30 = vld [vmem:[%s504_s0 + $0x18] sm:$0xff] }
   0x8   :  { %v20_v27 = vld [vmem:[%s504_s0 + $0x48] sm:$0xff]  ;;  %v21_v29 = vld [vmem:[%s504_s0 + $0x50] sm:$0xff]  ;;  %v22_v31 = vld [vmem:[%s504_s0 + $0x58] sm:$0xff] }
   0x9   :  { %303 = vmatpush3.bf16.msra.mxu0 %v300_v5  ;;  %337 = vmatpush3.bf16.msra.mxu1 %v300_v5  ;;  %v15_v32 = vld [vmem:[%s504_s0 + $0x20] sm:$0xff]  ;;  %v16_v34 = vld [vmem:[%s504_s0 + $0x28] sm:$0xff]  ;;  %v17_v36 = vld [vmem:[%s504_s0 + $0x30] sm:$0xff] }
   0xa   :  { %305 = vmatprep.subr.bf16.mxu0 %v304_v8  ;;  %330 = vmatprep.subr.bf16.mxu1 %v304_v8  ;;  %v23_v33 = vld [vmem:[%s504_s0 + $0x60] sm:$0xff]  ;;  %v24_v35 = vld [vmem:[%s504_s0 + $0x68] sm:$0xff]  ;;  %v25_v37 = vld [vmem:[%s504_s0 + $0x70] sm:$0xff] }
   0xb   :  { %v18_v38 = vld [vmem:[%s504_s0 + $0x38] sm:$0xff] }
   0xc   :  { %v26_v39 = vld [vmem:[%s504_s0 + $0x78] sm:$0xff] }
   0xd   :  { %307 = vmatpush3.bf16.msra.mxu0 %v304_v8  ;;  %338 = vmatpush3.bf16.msra.mxu1 %v304_v8 }
   0xe   :  { %309 = vmatprep.subr.bf16.mxu0 %v308_v13  ;;  %331 = vmatprep.subr.bf16.mxu1 %v308_v13 }
  0x11   :  { %311 = vmatpush3.bf16.msra.mxu0 %v308_v13  ;;  %339 = vmatpush3.bf16.msra.mxu1 %v308_v13 }
  0x12   :  { %313 = vmatprep.subr.bf16.mxu0 %v312_v16  ;;  %332 = vmatprep.subr.bf16.mxu1 %v312_v16 }
  0x15   :  { %315 = vmatpush3.bf16.msra.mxu0 %v312_v16  ;;  %340 = vmatpush3.bf16.msra.mxu1 %v312_v16 }
  0x16   :  { %317 = vmatprep.subr.bf16.mxu0 %v316_v19  ;;  %333 = vmatprep.subr.bf16.mxu1 %v316_v19 }
  0x19   :  { %319 = vmatpush3.bf16.msra.mxu0 %v316_v19  ;;  %341 = vmatpush3.bf16.msra.mxu1 %v316_v19 }
  0x1a   :  { %321 = vmatprep.subr.bf16.mxu0 %v320_v22  ;;  %334 = vmatprep.subr.bf16.mxu1 %v320_v22 }
  0x1d   :  { %323 = vmatpush3.bf16.msra.mxu0 %v320_v22  ;;  %342 = vmatpush3.bf16.msra.mxu1 %v320_v22 }
  0x1e   :  { %325 = vmatprep.subr.bf16.mxu0 %v324_v25  ;;  %335 = vmatprep.subr.bf16.mxu1 %v324_v25 }
  0x21   :  { %327 = vmatpush3.bf16.msra.mxu0 %v324_v25  ;;  %343 = vmatpush3.bf16.msra.mxu1 %v324_v25 }
  0x24   :  { %273 = vmatmul.mubr.f32.vlgmr.msra.gmra.mrb[0].mxu0 %v12_v26  ;;  %285 = vmatmul.mubr.f32.vlgmr.msra.gmra.mrb[0].mxu1 %v20_v27 }
  0x25   :  { %275 = vmatprep.mubr.f32.mxu0 %v13_v28  ;;  %287 = vmatprep.mubr.f32.mxu1 %v21_v29 }
  0x28   :  { %276 = vmatmul.mubr.f32.gmra.mrb[2].mxu0 %v14_v30  ;;  %288 = vmatmul.mubr.f32.gmra.mrb[2].mxu1 %v22_v31 }
  0x29   :  { %278 = vmatprep.mubr.f32.mxu0 %v15_v32  ;;  %290 = vmatprep.mubr.f32.mxu1 %v23_v33 }
  0x2c   :  { %279 = vmatmul.mubr.f32.gmra.mrb[4].mxu0 %v16_v34  ;;  %291 = vmatmul.mubr.f32.gmra.mrb[4].mxu1 %v24_v35 }
  0x2d   :  { %281 = vmatprep.mubr.f32.mxu0 %v17_v36  ;;  %293 = vmatprep.mubr.f32.mxu1 %v25_v37 }
  0x30   :  { %282 = vmatmul.mubr.f32.gmra.mrb[6].mxu0 %v18_v38  ;;  %294 = vmatmul.mubr.f32.gmra.mrb[6].mxu1 %v26_v39 }
  0xf7   :  { %v274_v40 = vpop.f32.mrb[0].mxu0  ;;  %v286_v41 = vpop.f32.mrb[0].mxu1 }
  0xf8   :  { %189 = vst [vmem:[%s505_s2 + $0x8] sm:$0xff] %v274_v40  ;;  %197 = vst [vmem:[%s505_s2 + $0x48] sm:$0xff] %v286_v41  ;;  %v109_v42 = vpop.f32.mrb[1].mxu0  ;;  %v149_v43 = vpop.f32.mrb[1].mxu1 }
  0xf9   :  { %188 = vst [vmem:[%s505_s2] sm:$0xff] %v109_v42  ;;  %196 = vst [vmem:[%s505_s2 + $0x40] sm:$0xff] %v149_v43 }
  0xfb   :  { %v277_v44 = vpop.f32.mrb[2].mxu0  ;;  %v289_v45 = vpop.f32.mrb[2].mxu1 }
  0xfc   :  { %191 = vst [vmem:[%s505_s2 + $0x18] sm:$0xff] %v277_v44  ;;  %199 = vst [vmem:[%s505_s2 + $0x58] sm:$0xff] %v289_v45  ;;  %v119_v46 = vpop.f32.mrb[3].mxu0  ;;  %v159_v47 = vpop.f32.mrb[3].mxu1 }
  0xfd   :  { %190 = vst [vmem:[%s505_s2 + $0x10] sm:$0xff] %v119_v46  ;;  %198 = vst [vmem:[%s505_s2 + $0x50] sm:$0xff] %v159_v47 }
  0xff   :  { %v280_v48 = vpop.f32.mrb[4].mxu0  ;;  %v292_v49 = vpop.f32.mrb[4].mxu1 }
 0x100   :  { %193 = vst [vmem:[%s505_s2 + $0x28] sm:$0xff] %v280_v48  ;;  %201 = vst [vmem:[%s505_s2 + $0x68] sm:$0xff] %v292_v49  ;;  %v129_v50 = vpop.f32.mrb[5].mxu0  ;;  %v169_v51 = vpop.f32.mrb[5].mxu1 }
 0x101   :  { %192 = vst [vmem:[%s505_s2 + $0x20] sm:$0xff] %v129_v50  ;;  %200 = vst [vmem:[%s505_s2 + $0x60] sm:$0xff] %v169_v51 }
 0x103   :  { %v283_v52 = vpop.f32.mrb[6].mxu0  ;;  %v295_v53 = vpop.f32.mrb[6].mxu1 }
 0x104   :  { %195 = vst [vmem:[%s505_s2 + $0x38] sm:$0xff] %v283_v52  ;;  %203 = vst [vmem:[%s505_s2 + $0x78] sm:$0xff] %v295_v53  ;;  %v139_v54 = vpop.f32.mrb[7].mxu0  ;;  %v179_v55 = vpop.f32.mrb[7].mxu1 }
 0x105   :  { %194 = vst [vmem:[%s505_s2 + $0x30] sm:$0xff] %v139_v54  ;;  %202 = vst [vmem:[%s505_s2 + $0x70] sm:$0xff] %v179_v55 }

// kernel: graph_conv_sparse.3
= control target key start
LH: loop header
LB: loop body
LE: loop exit
PB: predicated region body
PF: predicated region fallthrough
CT: control target
= control target key end

     0   :  { %v1472_v0 = vmov 0   ;;  %v1473_v17 = vmov 1   ;;  %v54_v18 = vlaneseq  ;;  %v1474_v23 = vmov 1.0   ;;  %s1954_s1 = inlined_call_operand.vmem [shape: s32[128,2], index: 1, kind: input, shape index: {}]   ;;  %s1955_s0 = inlined_call_operand.vmem [shape: s32[2,128], index: 0, kind: input, shape index: {}]   ;;  %s1956_s2 = inlined_call_operand.vmem [shape: f32[128,128], index: 2, kind: input, shape index: {}]   ;;  %s1957_s3 = inlined_call_operand.vmem [shape: f32[128,128], index: 3, kind: output, shape index: {}]  }
   0x1   :  { %1469 = vset.pattern.permute.xlu1 %v1472_v0  ;;  %1468 = vset.pattern.permute.xlu0 %v1472_v0  ;;  %v40_v1 = vld [vmem:[%s1954_s1 + $0x10] sm:$0xff]  ;;  %v38_v2 = vld [vmem:[%s1954_s1] sm:$0xff]  ;;  %v41_v3 = vld [vmem:[%s1954_s1 + $0x18] sm:$0xff]  ;;  %v1475_v0 = vmov 1.0|1.0  }
   0x2   :  { %203 = vperm.xlu1 %1469, %v40_v1   ;;  %197 = vperm.xlu0 %1468, %v38_v2   ;;  %v39_v4 = vld [vmem:[%s1954_s1 + $0x8] sm:$0xff]  ;;  %v42_v6 = vld [vmem:[%s1954_s1 + $0x20] sm:$0xff]  ;;  %v45_v7 = vld [vmem:[%s1954_s1 + $0x38] sm:$0xff]  ;;  %v1545_v19 = vshrl.u32 %v54_v18, 7  ;;  %v1710_v61 = vand.u32 127, %v54_v18 }
   0x3   :  { %v43_v5 = vld [vmem:[%s1954_s1 + $0x28] sm:$0xff]  ;;  %v44_v8 = vld [vmem:[%s1954_s1 + $0x30] sm:$0xff]  ;;  %v46_v10 = vld [vmem:[%s1954_s1 + $0x40] sm:$0xff] }
   0x4   :  { %v47_v9 = vld [vmem:[%s1954_s1 + $0x48] sm:$0xff]  ;;  %v49_v11 = vld [vmem:[%s1954_s1 + $0x58] sm:$0xff]  ;;  %v48_v12 = vld [vmem:[%s1954_s1 + $0x50] sm:$0xff]  ;;  %v1553_v21 = vadd.s32 8, %v1545_v19  ;;  %v1568_v24 = vadd.s32 16, %v1545_v19  ;;  %v1571_v25 = vadd.s32 24, %v1545_v19 }
   0x5   :  { %v51_v13 = vld [vmem:[%s1954_s1 + $0x68] sm:$0xff]  ;;  %v50_v14 = vld [vmem:[%s1954_s1 + $0x60] sm:$0xff]  ;;  %v53_v15 = vld [vmem:[%s1954_s1 + $0x78] sm:$0xff]  ;;  %v1578_v26 = vadd.s32 32, %v1545_v19  ;;  %v1581_v27 = vadd.s32 40, %v1545_v19  ;;  %v1588_v28 = vadd.s32 48, %v1545_v19 }
   0x6   :  { %206 = vperm.xlu1 %1469, %v41_v3   ;;  %200 = vperm.xlu0 %1468, %v39_v4   ;;  %v52_v16 = vld [vmem:[%s1954_s1 + $0x70] sm:$0xff]  ;;  %v1550_v20 = vld [vmem:[%s1955_s0 + $0x1] ss:$0 sm:$0xff]  ;;  %v1560_v22 = vld [vmem:[%s1955_s0] ss:$0 sm:$0xff]  ;;  %v1591_v29 = vadd.s32 56, %v1545_v19 }
   0x7   :  { %vm144_vm0 = vcmp.eq.s32.totalorder %v1545_v19, %v1550_v20  ;;  %vm145_vm1 = vcmp.eq.s32.totalorder %v1553_v21, %v1550_v20  ;;  %vm146_vm3 = vcmp.eq.s32.totalorder %v1568_v24, %v1550_v20  ;;  %vm147_vm4 = vcmp.eq.s32.totalorder %v1571_v25, %v1550_v20  ;;  %v710_v38 = vld [vmem:[%s1956_s2] sm:$0xff]  ;;  %v711_v39 = vld [vmem:[%s1956_s2 + $0x8] sm:$0xff]  ;;  %v712_v40 = vld [vmem:[%s1956_s2 + $0x10] sm:$0xff] }
   0x8   :  { %1216 = vmatprep.mubr.msk.f32.mxu0 %vm144_vm0, %v1474_v23  ;;  %vm148_vm5 = vcmp.eq.s32.totalorder %v1578_v26, %v1550_v20  ;;  %vm149_vm6 = vcmp.eq.s32.totalorder %v1581_v27, %v1550_v20  ;;  %vm150_vm7 = vcmp.eq.s32.totalorder %v1588_v28, %v1550_v20  ;;  %vm151_vm8 = vcmp.eq.s32.totalorder %v1591_v29, %v1550_v20  ;;  %v713_v42 = vld [vmem:[%s1956_s2 + $0x18] sm:$0xff]  ;;  %v714_v44 = vld [vmem:[%s1956_s2 + $0x20] sm:$0xff]  ;;  %v715_v45 = vld [vmem:[%s1956_s2 + $0x28] sm:$0xff] }
   0x9   :  { %v1598_v30 = vadd.s32 64, %v1545_v19  ;;  %v1601_v31 = vadd.s32 72, %v1545_v19  ;;  %v1608_v32 = vadd.s32 80, %v1545_v19  ;;  %v1611_v33 = vadd.s32 88, %v1545_v19  ;;  %v716_v47 = vld [vmem:[%s1956_s2 + $0x30] sm:$0xff]  ;;  %v717_v48 = vld [vmem:[%s1956_s2 + $0x38] sm:$0xff] }
   0xa   :  { %212 = vperm.xlu1 %1469, %v43_v5   ;;  %209 = vperm.xlu0 %1468, %v42_v6   ;;  %v1618_v34 = vadd.s32 96, %v1545_v19  ;;  %v1621_v35 = vadd.s32 104, %v1545_v19  ;;  %v1628_v36 = vadd.s32 112, %v1545_v19  ;;  %v1631_v37 = vadd.s32 120, %v1545_v19  ;;  %v718_v50 = vld [vmem:[%s1956_s2 + $0x40] sm:$0xff]  ;;  %v719_v51 = vld [vmem:[%s1956_s2 + $0x48] sm:$0xff] }
   0xb   :  { %v1416_v41 = vpack.c.bf16 %v711_v39, %v710_v38  ;;  %v1420_v43 = vpack.c.bf16 %v713_v42, %v712_v40  ;;  %v1424_v46 = vpack.c.bf16 %v715_v45, %v714_v44  ;;  %v1428_v49 = vpack.c.bf16 %v717_v48, %v716_v47  ;;  %v720_v53 = vld [vmem:[%s1956_s2 + $0x50] sm:$0xff]  ;;  %v721_v54 = vld [vmem:[%s1956_s2 + $0x58] sm:$0xff]  ;;  %v722_v56 = vld [vmem:[%s1956_s2 + $0x60] sm:$0xff] }
   0xc   :  { %v1432_v52 = vpack.c.bf16 %v719_v51, %v718_v50  ;;  %v1436_v55 = vpack.c.bf16 %v721_v54, %v720_v53  ;;  %v723_v57 = vld [vmem:[%s1956_s2 + $0x68] sm:$0xff] }
   0xd   :  { %1417 = vmatprep.subr.bf16.mxu1 %v1416_v41  ;;  %v1440_v58 = vpack.c.bf16 %v723_v57, %v722_v56 }
   0xe   :  { %218 = vperm.xlu1 %1469, %v45_v7   ;;  %215 = vperm.xlu0 %1468, %v44_v8  }
   0xf   :  { %1419 = vmatpush3.bf16.msra.mxu1 %v1416_v41 }
  0x10   :  { %1421 = vmatprep.subr.bf16.mxu1 %v1420_v43 }
  0x12   :  { %224 = vperm.xlu1 %1469, %v47_v9   ;;  %221 = vperm.xlu0 %1468, %v46_v10  }
  0x13   :  { %1423 = vmatpush3.bf16.msra.mxu1 %v1420_v43 }
  0x14   :  { %1425 = vmatprep.subr.bf16.mxu1 %v1424_v46 }
  0x16   :  { %230 = vperm.xlu1 %1469, %v49_v11   ;;  %227 = vperm.xlu0 %1468, %v48_v12  }
  0x17   :  { %1427 = vmatpush3.bf16.msra.mxu1 %v1424_v46 }
  0x18   :  { %1429 = vmatprep.subr.bf16.mxu1 %v1428_v49 }
  0x1a   :  { %236 = vperm.xlu1 %1469, %v51_v13   ;;  %233 = vperm.xlu0 %1468, %v50_v14  }
  0x1b   :  { %1431 = vmatpush3.bf16.msra.mxu1 %v1428_v49 }
  0x1c   :  { %1433 = vmatprep.subr.bf16.mxu1 %v1432_v52 }
  0x1e   :  { %242 = vperm.xlu1 %1469, %v53_v15   ;;  %239 = vperm.xlu0 %1468, %v52_v16  }
  0x1f   :  { %1435 = vmatpush3.bf16.msra.mxu1 %v1432_v52 }
  0x20   :  { %1437 = vmatprep.subr.bf16.mxu1 %v1436_v55 }
  0x22   :  { %1471 = vset.pattern.permute.xlu1 %v1473_v17  ;;  %1470 = vset.pattern.permute.xlu0 %v1473_v17 }
  0x23   :  { %296 = vperm.xlu1 %1471, %v39_v4   ;;  %293 = vperm.xlu0 %1470, %v38_v2  }
  0x24   :  { %1439 = vmatpush3.bf16.msra.mxu1 %v1436_v55 }
  0x25   :  { %1441 = vmatprep.subr.bf16.mxu1 %v1440_v58 }
  0x27   :  { %299 = vperm.xlu1 %1471, %v40_v1   ;;  %302 = vperm.xlu0 %1470, %v41_v3  }
  0x28   :  { %1443 = vmatpush3.bf16.msra.mxu1 %v1440_v58 }
  0x2b   :  { %305 = vperm.xlu1 %1471, %v42_v6   ;;  %308 = vperm.xlu0 %1470, %v43_v5  }
  0x2f   :  { %311 = vperm.xlu1 %1471, %v44_v8   ;;  %314 = vperm.xlu0 %1470, %v45_v7  }
  0x33   :  { %317 = vperm.xlu1 %1471, %v46_v10   ;;  %320 = vperm.xlu0 %1470, %v47_v9  }
  0x37   :  { %323 = vperm.xlu1 %1471, %v48_v12   ;;  %326 = vperm.xlu0 %1470, %v49_v11  }
  0x3b   :  { %329 = vperm.xlu1 %1471, %v50_v14   ;;  %332 = vperm.xlu0 %1470, %v51_v13  }
  0x3f   :  { %335 = vperm.xlu1 %1471, %v52_v16   ;;  %338 = vperm.xlu0 %1470, %v53_v15  }
  0x81   :  { %v204_v59 = vpop.permute.xlu1 %203  ;;  %v198_v60 = vpop.permute.xlu0 %197 }
  0x82   :  { %vm246_vm0 = vcmp.eq.s32.totalorder %v204_v59, %v1710_v61  ;;  %vm244_vm15 = vcmp.eq.s32.totalorder %v198_v60, %v1710_v61 }
  0x85   :  { %v207_v62 = vpop.permute.xlu1 %206  ;;  %v201_v63 = vpop.permute.xlu0 %200 }
  0x86   :  { %vm245_vm2 = vcmp.eq.s32.totalorder %v201_v63, %v1710_v61  ;;  %vm247_vm11 = vcmp.eq.s32.totalorder %v207_v62, %v1710_v61 }
  0x87   :  { %vm1352_vm12 = vmpackc.low %vm245_vm2, %vm244_vm15 }
  0x88   :  { %1353 = vmatprep.subr.msk.bf16.mxu0 %vm1352_vm12, %v1475_v0  ;;  %vm1356_vm14 = vmpackc.low %vm247_vm11, %vm246_vm0 }
  0x89   :  { %v213_v1 = vpop.permute.xlu1 %212  ;;  %v210_v2 = vpop.permute.xlu0 %209  ;;  %1355 = vmatpush3.bf16.msk.msra.mxu0 %vm1352_vm12, %v1475_v0 }
  0x8a   :  { %vm249_vm13 = vcmp.eq.s32.totalorder %v213_v1, %v1710_v61  ;;  %vm248_vm10 = vcmp.eq.s32.totalorder %v210_v2, %v1710_v61  ;;  %1357 = vmatprep.subr.msk.bf16.mxu0 %vm1356_vm14, %v1475_v0 }
  0x8b   :  { %vm1360_vm9 = vmpackc.low %vm249_vm13, %vm248_vm10 }
  0x8d   :  { %v219_v3 = vpop.permute.xlu1 %218  ;;  %v216_v4 = vpop.permute.xlu0 %215  ;;  %1359 = vmatpush3.bf16.msk.msra.mxu0 %vm1356_vm14, %v1475_v0 }
  0x8e   :  { %vm251_vm2 = vcmp.eq.s32.totalorder %v219_v3, %v1710_v61  ;;  %vm250_vm15 = vcmp.eq.s32.totalorder %v216_v4, %v1710_v61  ;;  %1361 = vmatprep.subr.msk.bf16.mxu0 %vm1360_vm9, %v1475_v0 }
  0x8f   :  { %vm1364_vm11 = vmpackc.low %vm251_vm2, %vm250_vm15 }
  0x91   :  { %v225_v5 = vpop.permute.xlu1 %224  ;;  %v222_v6 = vpop.permute.xlu0 %221  ;;  %1363 = vmatpush3.bf16.msk.msra.mxu0 %vm1360_vm9, %v1475_v0 }
  0x92   :  { %vm253_vm12 = vcmp.eq.s32.totalorder %v225_v5, %v1710_v61  ;;  %vm252_vm0 = vcmp.eq.s32.totalorder %v222_v6, %v1710_v61  ;;  %1365 = vmatprep.subr.msk.bf16.mxu0 %vm1364_vm11, %v1475_v0 }
  0x93   :  { %vm1368_vm10 = vmpackc.low %vm253_vm12, %vm252_vm0 }
  0x95   :  { %v231_v7 = vpop.permute.xlu1 %230  ;;  %v228_v8 = vpop.permute.xlu0 %227  ;;  %1367 = vmatpush3.bf16.msk.msra.mxu0 %vm1364_vm11, %v1475_v0 }
  0x96   :  { %vm255_vm13 = vcmp.eq.s32.totalorder %v231_v7, %v1710_v61  ;;  %vm254_vm14 = vcmp.eq.s32.totalorder %v228_v8, %v1710_v61  ;;  %1369 = vmatprep.subr.msk.bf16.mxu0 %vm1368_vm10, %v1475_v0 }
  0x97   :  { %vm1372_vm9 = vmpackc.low %vm255_vm13, %vm254_vm14 }
  0x99   :  { %v237_v9 = vpop.permute.xlu1 %236  ;;  %v234_v10 = vpop.permute.xlu0 %233  ;;  %1371 = vmatpush3.bf16.msk.msra.mxu0 %vm1368_vm10, %v1475_v0 }
  0x9a   :  { %vm257_vm2 = vcmp.eq.s32.totalorder %v237_v9, %v1710_v61  ;;  %vm256_vm15 = vcmp.eq.s32.totalorder %v234_v10, %v1710_v61  ;;  %1373 = vmatprep.subr.msk.bf16.mxu0 %vm1372_vm9, %v1475_v0 }
  0x9b   :  { %vm1376_vm11 = vmpackc.low %vm257_vm2, %vm256_vm15 }
  0x9d   :  { %v243_v11 = vpop.permute.xlu1 %242  ;;  %v240_v12 = vpop.permute.xlu0 %239  ;;  %1375 = vmatpush3.bf16.msk.msra.mxu0 %vm1372_vm9, %v1475_v0 }
  0x9e   :  { %vm259_vm12 = vcmp.eq.s32.totalorder %v243_v11, %v1710_v61  ;;  %vm258_vm0 = vcmp.eq.s32.totalorder %v240_v12, %v1710_v61  ;;  %1377 = vmatprep.subr.msk.bf16.mxu0 %vm1376_vm11, %v1475_v0 }
  0x9f   :  { %vm1380_vm13 = vmpackc.low %vm259_vm12, %vm258_vm0 }
  0xa1   :  { %1379 = vmatpush3.bf16.msk.msra.mxu0 %vm1376_vm11, %v1475_v0 }
  0xa2   :  { %v297_v13 = vpop.permute.xlu1 %296  ;;  %v294_v14 = vpop.permute.xlu0 %293  ;;  %1381 = vmatprep.subr.msk.bf16.mxu0 %vm1380_vm13, %v1475_v0 }
  0xa3   :  { %vm341_vm10 = vcmp.eq.s32.totalorder %v297_v13, %v1710_v61  ;;  %vm340_vm14 = vcmp.eq.s32.totalorder %v294_v14, %v1710_v61 }
  0xa4   :  { %vm1384_vm2 = vmpackc.low %vm341_vm10, %vm340_vm14 }
  0xa5   :  { %1383 = vmatpush3.bf16.msk.msra.mxu0 %vm1380_vm13, %v1475_v0 }
  0xa6   :  { %v300_v15 = vpop.permute.xlu1 %299  ;;  %v303_v16 = vpop.permute.xlu0 %302  ;;  %1385 = vmatprep.subr.msk.bf16.mxu0 %vm1384_vm2, %v1475_v0 }
  0xa7   :  { %vm342_vm9 = vcmp.eq.s32.totalorder %v300_v15, %v1710_v61  ;;  %vm343_vm15 = vcmp.eq.s32.totalorder %v303_v16, %v1710_v61 }
  0xa8   :  { %vm1388_vm11 = vmpackc.low %vm343_vm15, %vm342_vm9  ;;  %1217 = vmatmul.mubr.msk.f32.vlgmr.msra.gmra.mrb[0].mxu0 %vm145_vm1, %v1474_v23  ;;  %vm1960_vm15 = vcmp.eq.s32.totalorder %v1608_v32, %v1550_v20 }
  0xa9   :  { %1387 = vmatpush3.bf16.msk.msra.mxu0 %vm1384_vm2, %v1475_v0  ;;  %1219 = vmatprep.mubr.msk.f32.mxu0 %vm146_vm3, %v1474_v23 }
  0xaa   :  { %v306_v17 = vpop.permute.xlu1 %305  ;;  %v309_v18 = vpop.permute.xlu0 %308  ;;  %1389 = vmatprep.subr.msk.bf16.mxu0 %vm1388_vm11, %v1475_v0 }
  0xab   :  { %vm344_vm12 = vcmp.eq.s32.totalorder %v306_v17, %v1710_v61  ;;  %vm345_vm0 = vcmp.eq.s32.totalorder %v309_v18, %v1710_v61 }
  0xac   :  { %vm1392_vm13 = vmpackc.low %vm345_vm0, %vm344_vm12  ;;  %1220 = vmatmul.mubr.msk.f32.gmra.mrb[2].mxu0 %vm147_vm4, %v1474_v23 }
  0xad   :  { %1391 = vmatpush3.bf16.msk.msra.mxu0 %vm1388_vm11, %v1475_v0  ;;  %1222 = vmatprep.mubr.msk.f32.mxu0 %vm148_vm5, %v1474_v23 }
  0xae   :  { %v312_v38 = vpop.permute.xlu1 %311  ;;  %v315_v39 = vpop.permute.xlu0 %314  ;;  %1393 = vmatprep.subr.msk.bf16.mxu0 %vm1392_vm13, %v1475_v0 }
  0xaf   :  { %vm346_vm1 = vcmp.eq.s32.totalorder %v312_v38, %v1710_v61  ;;  %vm347_vm3 = vcmp.eq.s32.totalorder %v315_v39, %v1710_v61 }
  0xb0   :  { %vm1396_vm10 = vmpackc.low %vm347_vm3, %vm346_vm1  ;;  %1223 = vmatmul.mubr.msk.f32.gmra.mrb[4].mxu0 %vm149_vm6, %v1474_v23  ;;  %vm1958_vm6 = vcmp.eq.s32.totalorder %v1598_v30, %v1550_v20  ;;  %vm1962_vm1 = vcmp.eq.s32.totalorder %v1618_v34, %v1550_v20 }
  0xb1   :  { %1395 = vmatpush3.bf16.msk.msra.mxu0 %vm1392_vm13, %v1475_v0  ;;  %1225 = vmatprep.mubr.msk.f32.mxu0 %vm150_vm7, %v1474_v23  ;;  %vm1961_vm13 = vcmp.eq.s32.totalorder %v1611_v33, %v1550_v20 }
  0xb2   :  { %v318_v40 = vpop.permute.xlu1 %317  ;;  %v321_v41 = vpop.permute.xlu0 %320  ;;  %1397 = vmatprep.subr.msk.bf16.mxu0 %vm1396_vm10, %v1475_v0 }
  0xb3   :  { %vm348_vm4 = vcmp.eq.s32.totalorder %v318_v40, %v1710_v61  ;;  %vm349_vm5 = vcmp.eq.s32.totalorder %v321_v41, %v1710_v61 }
  0xb4   :  { %vm1400_vm14 = vmpackc.low %vm349_vm5, %vm348_vm4  ;;  %1226 = vmatmul.mubr.msk.f32.gmra.mrb[6].mxu0 %vm151_vm8, %v1474_v23  ;;  %vm1959_vm8 = vcmp.eq.s32.totalorder %v1601_v31, %v1550_v20  ;;  %vm1963_vm5 = vcmp.eq.s32.totalorder %v1621_v35, %v1550_v20 }
  0xb5   :  { %1399 = vmatpush3.bf16.msk.msra.mxu0 %vm1396_vm10, %v1475_v0  ;;  %1228 = vmatprep.mubr.msk.f32.mxu0 %vm1958_vm6, %v1474_v23  ;;  %vm1965_vm6 = vcmp.eq.s32.totalorder %v1631_v37, %v1550_v20 }
  0xb6   :  { %v324_v42 = vpop.permute.xlu1 %323  ;;  %v327_v43 = vpop.permute.xlu0 %326  ;;  %1401 = vmatprep.subr.msk.bf16.mxu0 %vm1400_vm14, %v1475_v0 }
  0xb7   :  { %vm350_vm7 = vcmp.eq.s32.totalorder %v324_v42, %v1710_v61  ;;  %vm351_vm2 = vcmp.eq.s32.totalorder %v327_v43, %v1710_v61 }
  0xb8   :  { %vm1404_vm9 = vmpackc.low %vm351_vm2, %vm350_vm7  ;;  %1229 = vmatmul.mubr.msk.f32.gmra.mrb[8].mxu0 %vm1959_vm8, %v1474_v23  ;;  %vm1966_vm7 = vcmp.eq.s32.totalorder %v1545_v19, %v1560_v22  ;;  %vm1967_vm2 = vcmp.eq.s32.totalorder %v1553_v21, %v1560_v22  ;;  %vm1969_vm8 = vcmp.eq.s32.totalorder %v1571_v25, %v1560_v22  ;;  %v724_v19 = vld [vmem:[%s1956_s2 + $0x70] sm:$0xff] }
  0xb9   :  { %1403 = vmatpush3.bf16.msk.msra.mxu0 %vm1400_vm14, %v1475_v0  ;;  %1231 = vmatprep.mubr.msk.f32.mxu0 %vm1960_vm15, %v1474_v23  ;;  %vm1964_vm14 = vcmp.eq.s32.totalorder %v1628_v36, %v1550_v20  ;;  %vm1970_vm15 = vcmp.eq.s32.totalorder %v1578_v26, %v1560_v22  ;;  %v725_v20 = vld [vmem:[%s1956_s2 + $0x78] sm:$0xff] }
  0xba   :  { %v330_v44 = vpop.permute.xlu1 %329  ;;  %v333_v45 = vpop.permute.xlu0 %332  ;;  %1405 = vmatprep.subr.msk.bf16.mxu0 %vm1404_vm9, %v1475_v0  ;;  %v1444_v21 = vpack.c.bf16 %v725_v20, %v724_v19 }
  0xbb   :  { %vm352_vm11 = vcmp.eq.s32.totalorder %v330_v44, %v1710_v61  ;;  %vm353_vm12 = vcmp.eq.s32.totalorder %v333_v45, %v1710_v61 }
  0xbc   :  { %vm1408_vm0 = vmpackc.low %vm353_vm12, %vm352_vm11  ;;  %1232 = vmatmul.mubr.msk.f32.gmra.mrb[10].mxu0 %vm1961_vm13, %v1474_v23  ;;  %vm1971_vm11 = vcmp.eq.s32.totalorder %v1581_v27, %v1560_v22  ;;  %vm1972_vm12 = vcmp.eq.s32.totalorder %v1588_v28, %v1560_v22  ;;  %vm1974_vm13 = vcmp.eq.s32.totalorder %v1598_v30, %v1560_v22  ;;  %1445 = vmatprep.subr.bf16.mxu1 %v1444_v21 }
  0xbd   :  { %1407 = vmatpush3.bf16.msk.msra.mxu0 %vm1404_vm9, %v1475_v0  ;;  %1234 = vmatprep.mubr.msk.f32.mxu0 %vm1962_vm1, %v1474_v23  ;;  %vm1968_vm9 = vcmp.eq.s32.totalorder %v1568_v24, %v1560_v22  ;;  %vm1975_vm1 = vcmp.eq.s32.totalorder %v1601_v31, %v1560_v22 }
  0xbe   :  { %v336_v46 = vpop.permute.xlu1 %335  ;;  %v339_v47 = vpop.permute.xlu0 %338  ;;  %1409 = vmatprep.subr.msk.bf16.mxu0 %vm1408_vm0, %v1475_v0  ;;  %1447 = vmatpush3.bf16.msra.mxu1 %v1444_v21 }
  0xbf   :  { %vm354_vm3 = vcmp.eq.s32.totalorder %v336_v46, %v1710_v61  ;;  %vm355_vm10 = vcmp.eq.s32.totalorder %v339_v47, %v1710_v61 }
  0xc0   :  { %vm1412_vm4 = vmpackc.low %vm355_vm10, %vm354_vm3  ;;  %1235 = vmatmul.mubr.msk.f32.gmra.mrb[12].mxu0 %vm1963_vm5, %v1474_v23  ;;  %vm1976_vm3 = vcmp.eq.s32.totalorder %v1608_v32, %v1560_v22  ;;  %vm1977_vm10 = vcmp.eq.s32.totalorder %v1611_v33, %v1560_v22  ;;  %vm1979_vm5 = vcmp.eq.s32.totalorder %v1621_v35, %v1560_v22 }
  0xc1   :  { %1411 = vmatpush3.bf16.msk.msra.mxu0 %vm1408_vm0, %v1475_v0  ;;  %1237 = vmatprep.mubr.msk.f32.mxu0 %vm1964_vm14, %v1474_v23  ;;  %vm1973_vm0 = vcmp.eq.s32.totalorder %v1591_v29, %v1560_v22  ;;  %vm1980_vm14 = vcmp.eq.s32.totalorder %v1628_v36, %v1560_v22 }
  0xc2   :  { %1413 = vmatprep.subr.msk.bf16.mxu0 %vm1412_vm4, %v1475_v0 }
  0xc4   :  { %1238 = vmatmul.mubr.msk.f32.gmra.mrb[14].mxu0 %vm1965_vm6, %v1474_v23  ;;  %vm1981_vm6 = vcmp.eq.s32.totalorder %v1631_v37, %v1560_v22 }
  0xc5   :  { %1415 = vmatpush3.bf16.msk.msra.mxu0 %vm1412_vm4, %v1475_v0  ;;  %1272 = vmatprep.mubr.msk.f32.mxu0 %vm1966_vm7, %v1474_v23  ;;  %vm1978_vm4 = vcmp.eq.s32.totalorder %v1618_v34, %v1560_v22 }
  0xc8   :  { %1273 = vmatmul.mubr.msk.f32.vlgmr.msra.gmra.mrb[0].mxu0 %vm1967_vm2, %v1474_v23 }
  0xc9   :  { %1275 = vmatprep.mubr.msk.f32.mxu0 %vm1968_vm9, %v1474_v23 }
  0xcc   :  { %1276 = vmatmul.mubr.msk.f32.gmra.mrb[2].mxu0 %vm1969_vm8, %v1474_v23 }
  0xcd   :  { %1278 = vmatprep.mubr.msk.f32.mxu0 %vm1970_vm15, %v1474_v23 }
  0xd0   :  { %1279 = vmatmul.mubr.msk.f32.gmra.mrb[4].mxu0 %vm1971_vm11, %v1474_v23 }
  0xd1   :  { %1281 = vmatprep.mubr.msk.f32.mxu0 %vm1972_vm12, %v1474_v23 }
  0xd4   :  { %1282 = vmatmul.mubr.msk.f32.gmra.mrb[6].mxu0 %vm1973_vm0, %v1474_v23 }
  0xd5   :  { %1284 = vmatprep.mubr.msk.f32.mxu0 %vm1974_vm13, %v1474_v23 }
  0xd8   :  { %1285 = vmatmul.mubr.msk.f32.gmra.mrb[8].mxu0 %vm1975_vm1, %v1474_v23 }
  0xd9   :  { %1287 = vmatprep.mubr.msk.f32.mxu0 %vm1976_vm3, %v1474_v23 }
  0xdc   :  { %1288 = vmatmul.mubr.msk.f32.gmra.mrb[10].mxu0 %vm1977_vm10, %v1474_v23 }
  0xdd   :  { %1290 = vmatprep.mubr.msk.f32.mxu0 %vm1978_vm4, %v1474_v23 }
  0xe0   :  { %1291 = vmatmul.mubr.msk.f32.gmra.mrb[12].mxu0 %vm1979_vm5, %v1474_v23 }
  0xe1   :  { %1293 = vmatprep.mubr.msk.f32.mxu0 %vm1980_vm14, %v1474_v23 }
  0xe4   :  { %1294 = vmatmul.mubr.msk.f32.gmra.mrb[14].mxu0 %vm1981_vm6, %v1474_v23 }
 0x19b   :  { %v1274_v24 = vpop.f32.mrb[0].mxu0 }
 0x19c   :  { %v599_v25 = vpop.f32.mrb[1].mxu0  ;;  %v679_v27 = vmin.f32 %v1274_v24, 1.0 }
 0x19d   :  { %v678_v26 = vmin.f32 %v599_v25, 1.0 }
 0x19f   :  { %v1277_v28 = vpop.f32.mrb[2].mxu0  ;;  %1328 = vmatprep.mubr.f32.mxu1 %v678_v26 }
 0x1a0   :  { %v609_v29 = vpop.f32.mrb[3].mxu0  ;;  %1329 = vmatmul.mubr.f32.vlgmr.msra.gmra.mrb[0].mxu1 %v679_v27  ;;  %v681_v23 = vmin.f32 %v1277_v28, 1.0 }
 0x1a1   :  { %v680_v22 = vmin.f32 %v609_v29, 1.0 }
 0x1a3   :  { %v1280_v30 = vpop.f32.mrb[4].mxu0  ;;  %1331 = vmatprep.mubr.f32.mxu1 %v680_v22 }
 0x1a4   :  { %v619_v31 = vpop.f32.mrb[5].mxu0  ;;  %1332 = vmatmul.mubr.f32.gmra.mrb[2].mxu1 %v681_v23  ;;  %v683_v33 = vmin.f32 %v1280_v30, 1.0 }
 0x1a5   :  { %v682_v32 = vmin.f32 %v619_v31, 1.0 }
 0x1a7   :  { %v1283_v34 = vpop.f32.mrb[6].mxu0  ;;  %1334 = vmatprep.mubr.f32.mxu1 %v682_v32 }
 0x1a8   :  { %v629_v35 = vpop.f32.mrb[7].mxu0  ;;  %1335 = vmatmul.mubr.f32.gmra.mrb[4].mxu1 %v683_v33  ;;  %v685_v37 = vmin.f32 %v1283_v34, 1.0 }
 0x1a9   :  { %v684_v36 = vmin.f32 %v629_v35, 1.0 }
 0x1ab   :  { %v1286_v48 = vpop.f32.mrb[8].mxu0  ;;  %1337 = vmatprep.mubr.f32.mxu1 %v684_v36 }
 0x1ac   :  { %v639_v49 = vpop.f32.mrb[9].mxu0  ;;  %1338 = vmatmul.mubr.f32.gmra.mrb[6].mxu1 %v685_v37  ;;  %v687_v51 = vmin.f32 %v1286_v48, 1.0 }
 0x1ad   :  { %v686_v50 = vmin.f32 %v639_v49, 1.0 }
 0x1af   :  { %v1289_v52 = vpop.f32.mrb[10].mxu0  ;;  %1340 = vmatprep.mubr.f32.mxu1 %v686_v50 }
 0x1b0   :  { %v649_v53 = vpop.f32.mrb[11].mxu0  ;;  %1341 = vmatmul.mubr.f32.gmra.mrb[8].mxu1 %v687_v51  ;;  %v689_v55 = vmin.f32 %v1289_v52, 1.0 }
 0x1b1   :  { %v688_v54 = vmin.f32 %v649_v53, 1.0 }
 0x1b3   :  { %v1292_v56 = vpop.f32.mrb[12].mxu0  ;;  %1343 = vmatprep.mubr.f32.mxu1 %v688_v54 }
 0x1b4   :  { %v659_v57 = vpop.f32.mrb[13].mxu0  ;;  %1344 = vmatmul.mubr.f32.gmra.mrb[10].mxu1 %v689_v55  ;;  %v691_v59 = vmin.f32 %v1292_v56, 1.0 }
 0x1b5   :  { %v690_v58 = vmin.f32 %v659_v57, 1.0 }
 0x1b7   :  { %v1295_v60 = vpop.f32.mrb[14].mxu0  ;;  %1346 = vmatprep.mubr.f32.mxu1 %v690_v58 }
 0x1b8   :  { %v669_v61 = vpop.f32.mrb[15].mxu0  ;;  %1347 = vmatmul.mubr.f32.gmra.mrb[12].mxu1 %v691_v59  ;;  %v693_v63 = vmin.f32 %v1295_v60, 1.0 }
 0x1b9   :  { %v692_v62 = vmin.f32 %v669_v61, 1.0 }
 0x1bb   :  { %1349 = vmatprep.mubr.f32.mxu1 %v692_v62 }
 0x1bc   :  { %1350 = vmatmul.mubr.f32.gmra.mrb[14].mxu1 %v693_v63 }
 0x273   :  { %v1330_v0 = vpop.f32.mrb[0].mxu1 }
 0x274   :  { %v923_v1 = vmax.f32 %v1330_v0, 0.0  ;;  %v792_v2 = vpop.f32.mrb[1].mxu1 }
 0x275   :  { %v922_v3 = vmax.f32 %v792_v2, 0.0 }
 0x276   :  { %939 = vst [vmem:[%s1957_s3 + $0x8] sm:$0xff] %v923_v1 }
 0x277   :  { %938 = vst [vmem:[%s1957_s3] sm:$0xff] %v922_v3  ;;  %v1333_v4 = vpop.f32.mrb[2].mxu1 }
 0x278   :  { %v925_v5 = vmax.f32 %v1333_v4, 0.0  ;;  %v802_v6 = vpop.f32.mrb[3].mxu1 }
 0x279   :  { %v924_v7 = vmax.f32 %v802_v6, 0.0 }
 0x27a   :  { %941 = vst [vmem:[%s1957_s3 + $0x18] sm:$0xff] %v925_v5 }
 0x27b   :  { %940 = vst [vmem:[%s1957_s3 + $0x10] sm:$0xff] %v924_v7  ;;  %v1336_v8 = vpop.f32.mrb[4].mxu1 }
 0x27c   :  { %v927_v9 = vmax.f32 %v1336_v8, 0.0  ;;  %v812_v10 = vpop.f32.mrb[5].mxu1 }
 0x27d   :  { %v926_v11 = vmax.f32 %v812_v10, 0.0 }
 0x27e   :  { %943 = vst [vmem:[%s1957_s3 + $0x28] sm:$0xff] %v927_v9 }
 0x27f   :  { %942 = vst [vmem:[%s1957_s3 + $0x20] sm:$0xff] %v926_v11  ;;  %v1339_v12 = vpop.f32.mrb[6].mxu1 }
 0x280   :  { %v929_v13 = vmax.f32 %v1339_v12, 0.0  ;;  %v822_v14 = vpop.f32.mrb[7].mxu1 }
 0x281   :  { %v928_v15 = vmax.f32 %v822_v14, 0.0 }
 0x282   :  { %945 = vst [vmem:[%s1957_s3 + $0x38] sm:$0xff] %v929_v13 }
 0x283   :  { %944 = vst [vmem:[%s1957_s3 + $0x30] sm:$0xff] %v928_v15  ;;  %v1342_v16 = vpop.f32.mrb[8].mxu1 }
 0x284   :  { %v931_v17 = vmax.f32 %v1342_v16, 0.0  ;;  %v832_v18 = vpop.f32.mrb[9].mxu1 }
 0x285   :  { %v930_v38 = vmax.f32 %v832_v18, 0.0 }
 0x286   :  { %947 = vst [vmem:[%s1957_s3 + $0x48] sm:$0xff] %v931_v17 }
 0x287   :  { %946 = vst [vmem:[%s1957_s3 + $0x40] sm:$0xff] %v930_v38  ;;  %v1345_v39 = vpop.f32.mrb[10].mxu1 }
 0x288   :  { %v933_v40 = vmax.f32 %v1345_v39, 0.0  ;;  %v842_v41 = vpop.f32.mrb[11].mxu1 }
 0x289   :  { %v932_v42 = vmax.f32 %v842_v41, 0.0 }
 0x28a   :  { %949 = vst [vmem:[%s1957_s3 + $0x58] sm:$0xff] %v933_v40 }
 0x28b   :  { %948 = vst [vmem:[%s1957_s3 + $0x50] sm:$0xff] %v932_v42  ;;  %v1348_v43 = vpop.f32.mrb[12].mxu1 }
 0x28c   :  { %v935_v44 = vmax.f32 %v1348_v43, 0.0  ;;  %v852_v45 = vpop.f32.mrb[13].mxu1 }
 0x28d   :  { %v934_v46 = vmax.f32 %v852_v45, 0.0 }
 0x28e   :  { %951 = vst [vmem:[%s1957_s3 + $0x68] sm:$0xff] %v935_v44 }
 0x28f   :  { %950 = vst [vmem:[%s1957_s3 + $0x60] sm:$0xff] %v934_v46  ;;  %v1351_v47 = vpop.f32.mrb[14].mxu1 }
 0x290   :  { %v937_v19 = vmax.f32 %v1351_v47, 0.0  ;;  %v862_v20 = vpop.f32.mrb[15].mxu1 }
 0x291   :  { %v936_v21 = vmax.f32 %v862_v20, 0.0 }
 0x292   :  { %953 = vst [vmem:[%s1957_s3 + $0x78] sm:$0xff] %v937_v19 }
 0x293   :  { %952 = vst [vmem:[%s1957_s3 + $0x70] sm:$0xff] %v936_v21 }

</bundles_post_ra>
